<compile_context>
chip_gen: v7x
topology: tpu7x:2x2x1
jax: 0.10.0
libtpu: 0.0.40
codegen_flags: <defaults>
</compile_context>

<pallas_src>
import jax
import jax.numpy as jnp
from jax.experimental import pallas as pl
from jax.experimental.pallas import tpu as pltpu


_LANE = 128
_TARGET_M = 256   # MXU-native M on v6e/v7x; two clean passes on v5e's 128x128.


def _round_up(x, m):
    return ((x + m - 1) // m) * m


def _sublane(dtype):
    # Minimum second-to-last-dim packing per element width (f32/bf16/int8).
    return {4: 8, 2: 16, 1: 32}[jnp.dtype(dtype).itemsize]


def _vmem_capacity_bytes():
    try:
        return int(pltpu.get_tpu_info().vmem_capacity_bytes)
    except Exception:  # conservative fallback (v7x-sized) if query unavailable
        return 64 << 20


def _vmem_estimate(block_b, t_pad, v_pad, d_pad, itemsize):
    m = block_b * t_pad
    return (
        2 * v_pad * d_pad * itemsize   # table (grid-invariant, but pipeline
                                       # still allocates 2 buffers - see TODO)
        + 2 * m * d_pad * itemsize     # output block, double-buffered
        + 4 * m * 4                    # ids + lens blocks, double-buffered
        + m * v_pad * itemsize         # one-hot operand
        + m * d_pad * 4                # f32 accumulator tile
        + (2 << 20)                    # compiler-internal headroom
    )


def _embed_squeeze_kernel(ids_ref, len_ref, emb_ref, out_ref):
    # ids_ref : VMEM (block_b, t_pad, 1)      int32
    # len_ref : VMEM (block_b, 1, 1)          int32
    # emb_ref : VMEM (v_pad, d_pad)           table dtype (zero-padded)
    # out_ref : VMEM (block_b, t_pad, d_pad)  table dtype
    block_b, t_pad, _ = ids_ref.shape
    v_pad, d_pad = emb_ref.shape
    m = block_b * t_pad

    # Vectorized length mask: positions t >= seq_len[b] get id -1, which
    # matches no one-hot column -> those output rows are exact zeros (the
    # Squeezer pack/pad round-trip).  Out-of-range pad ids are equally
    # harmless: there is no dynamic gather, so no OOB access can happen.
    t_iota = jax.lax.broadcasted_iota(jnp.int32, (block_b, t_pad, 1), 1)
    ids = jnp.where(t_iota < len_ref[...], ids_ref[...], -1)

    # Fused one-hot for the whole block: (m, v_pad).  t_pad is a multiple of
    # the sublane tile, so this reshape is a layout no-op.
    ids_col = ids.reshape(m, 1)
    v_iota = jax.lax.broadcasted_iota(jnp.int32, (m, v_pad), 1)
    onehot = (v_iota == ids_col).astype(emb_ref.dtype)

    # Single MXU matmul "gather" per grid step, one dense full-tile store.
    res = jnp.dot(onehot, emb_ref[...], preferred_element_type=jnp.float32)
    out_ref[...] = res.reshape(block_b, t_pad, d_pad).astype(out_ref.dtype)


def prepare_embedding_table(emb_table):
    """Zero-pad the table to lane-aligned (v_pad, d_pad) tiles.

    Do this ONCE at init and reuse across calls -- re-padding per call is a
    full HBM read+write of the whole table.
    """
    V, D = emb_table.shape
    return jnp.pad(emb_table,
                   ((0, _round_up(V, _LANE) - V), (0, _round_up(D, _LANE) - D)))


def transfer_embedding_with_squeezer(seq_ids, seq_len, emb_table, t_max,
                                     *, block_b=None, padded_table=None):
    """Embedding lookup + Squeezer (zero positions t >= seq_len[b]).

    seq_ids: (B, T) int, seq_len: (B,) int, emb_table: (V, D) float.
    Returns (B, t_max, D).  Ids at valid positions are assumed to lie in
    [0, V); out-of-range ids silently yield zero rows (unlike nn.Embedding,
    which raises).
    """
    B, T = seq_ids.shape
    V, D = emb_table.shape
    if padded_table is None:
        padded_table = prepare_embedding_table(emb_table)
    v_pad, d_pad = padded_table.shape
    itemsize = jnp.dtype(emb_table.dtype).itemsize

    t_pad = _round_up(max(t_max, 1), _sublane(emb_table.dtype))

    # Size the fused-matmul M = block_b * t_pad to the MXU height, then back
    # off if the estimated VMEM footprint would not fit this generation.
    vmem_budget = int(0.8 * _vmem_capacity_bytes())
    if block_b is None:
        block_b = _round_up(pl.cdiv(_TARGET_M, t_pad), 8)
    else:
        block_b = _round_up(max(block_b, 1), 8)
    while (block_b > 8 and
           _vmem_estimate(block_b, t_pad, v_pad, d_pad, itemsize) > vmem_budget):
        block_b -= 8

    b_pad = _round_up(B, block_b)
    grid = b_pad // block_b

    # Ids: truncate/pad time to t_pad, pad batch to b_pad, trailing singleton
    # so the in-kernel tile is already sublane-major (time on sublanes).
    ids = seq_ids.astype(jnp.int32)[:, : min(T, t_pad)]
    ids = jnp.pad(ids, ((0, b_pad - B), (0, t_pad - ids.shape[1])))
    ids = ids.reshape(b_pad, t_pad, 1)

    # Lengths: padded batch rows get length 0 -> exact zero output rows.
    lens = jnp.pad(seq_len.astype(jnp.int32), (0, b_pad - B))
    lens = lens.reshape(b_pad, 1, 1)

    vmem_needed = _vmem_estimate(block_b, t_pad, v_pad, d_pad, itemsize)
    vmem_limit = int(min(max(vmem_needed, 32 << 20), vmem_budget))

    out = pl.pallas_call(
        _embed_squeeze_kernel,
        out_shape=jax.ShapeDtypeStruct((b_pad, t_pad, d_pad), emb_table.dtype),
        grid=(grid,),
        in_specs=[
            pl.BlockSpec((block_b, t_pad, 1), lambda i: (i, 0, 0)),
            pl.BlockSpec((block_b, 1, 1), lambda i: (i, 0, 0)),
            pl.BlockSpec((v_pad, d_pad), lambda i: (0, 0)),
        ],
        out_specs=pl.BlockSpec((block_b, t_pad, d_pad), lambda i: (i, 0, 0)),
        compiler_params=pltpu.CompilerParams(
            dimension_semantics=("parallel",),
            vmem_limit_bytes=vmem_limit,
        ),
    )(ids, lens, padded_table)

    if (b_pad, t_pad, d_pad) == (B, t_max, D):
        return out
    return out[:B, :t_max, :D]


if __name__ == "__main__":
    B, T, V, D = 2, 8, 100, 32

    key = jax.random.PRNGKey(0)
    k_ids, k_emb = jax.random.split(key)

    seq_ids = jax.random.randint(k_ids, (B, T), 0, V, dtype=jnp.int32)
    seq_len = jnp.array([5, 7], dtype=jnp.int32)
    # Deterministic synthetic "pretrained" embedding weights (stands in for
    # transfer_cls.from_pretrained: no files / network access in this script).
    emb_table = jax.random.normal(k_emb, (V, D), dtype=jnp.float32)

    # Pad the table once at init (hoisted out of the per-call hot path).
    padded_table = prepare_embedding_table(emb_table)

    # TODO(synk): PyTorch's output time extent max(seq_len) is dynamic; JAX
    # needs a static shape, so it is resolved host-side (bucket t_max to a few
    # sizes in production to avoid a recompile per distinct max length).
    t_max = int(jnp.max(seq_len))

    out = transfer_embedding_with_squeezer(
        seq_ids, seq_len, emb_table, t_max, padded_table=padded_table)
    out = jax.block_until_ready(out)

    # Pure-JAX reference: lookup, truncate to t_max, zero past seq_len.
    ref = emb_table[seq_ids][:, :t_max, :]
    mask = (jnp.arange(t_max)[None, :] < seq_len[:, None])[:, :, None]
    ref = jnp.where(mask, ref, 0.0)

    assert out.shape == (B, t_max, D), out.shape
    assert jnp.allclose(out, ref, atol=1e-6), "mismatch vs reference"
    print("KERNEL_OK")
</pallas_src>

<mosaic_0001>
module attributes {stable_mosaic.version = 11 : i64} {
  func.func @_embed_squeeze_kernel(%arg0: i32, %arg1: memref<32x8x1xi32, #tpu.memory_space<vmem>>, %arg2: memref<32x1x1xi32, #tpu.memory_space<vmem>>, %arg3: memref<128x128xf32, #tpu.memory_space<vmem>>, %arg4: memref<32x8x128xf32, #tpu.memory_space<vmem>>) attributes {dimension_semantics = [#tpu.dimension_semantics<parallel>], iteration_bounds = array<i64: 1>, scalar_prefetch = 0 : i64, scratch_operands = 0 : i64, tpu.core_type = #tpu.core_type<tc>, window_params = [{transform_indices = @transform_0, window_bounds = array<i64: 32, 8, 1>}, {transform_indices = @transform_1, window_bounds = array<i64: 32, 1, 1>}, {pipeline_mode = #tpu.pipeline_mode<synchronous>, transform_indices = @transform_2, window_bounds = array<i64: 128, 128>}, {transform_indices = @transform_3, window_bounds = array<i64: 32, 8, 128>}]} {
    %0 = tpu.iota {dimensions = array<i32: 1>} : vector<32x8x1xi32>
    %c0 = arith.constant 0 : index
    %c0_0 = arith.constant 0 : index
    %c0_1 = arith.constant 0 : index
    %1 = vector.load %arg2[%c0, %c0_0, %c0_1] : memref<32x1x1xi32, #tpu.memory_space<vmem>>, vector<32x1x1xi32>
    %2 = vector.broadcast %1 : vector<32x1x1xi32> to vector<32x8x1xi32>
    %3 = arith.cmpi slt, %0, %2 : vector<32x8x1xi32>
    %c0_2 = arith.constant 0 : index
    %c0_3 = arith.constant 0 : index
    %c0_4 = arith.constant 0 : index
    %4 = vector.load %arg1[%c0_2, %c0_3, %c0_4] : memref<32x8x1xi32, #tpu.memory_space<vmem>>, vector<32x8x1xi32>
    %c-1_i32 = arith.constant -1 : i32
    %5 = vector.broadcast %c-1_i32 : i32 to vector<32x8x1xi32>
    %6 = arith.select %3, %4, %5 : vector<32x8x1xi1>, vector<32x8x1xi32>
    %7 = vector.shape_cast %6 : vector<32x8x1xi32> to vector<256x1xi32>
    %8 = tpu.iota {dimensions = array<i32: 1>} : vector<256x128xi32>
    %9 = vector.broadcast %7 : vector<256x1xi32> to vector<256x128xi32>
    %10 = arith.cmpi eq, %8, %9 : vector<256x128xi32>
    %11 = arith.extui %10 : vector<256x128xi1> to vector<256x128xi32>
    %12 = arith.sitofp %11 : vector<256x128xi32> to vector<256x128xf32>
    %c0_5 = arith.constant 0 : index
    %c0_6 = arith.constant 0 : index
    %13 = vector.load %arg3[%c0_5, %c0_6] : memref<128x128xf32, #tpu.memory_space<vmem>>, vector<128x128xf32>
    %cst = arith.constant dense<0.000000e+00> : vector<256x128xf32>
    %14 = tpu.matmul %12, %13, %cst {dimension_numbers = #tpu.dot_dimension_numbers<[1], [0], [0], [1], [0, 0, 1, 1], [], []>} : vector<256x128xf32>, vector<128x128xf32>, vector<256x128xf32> -> vector<256x128xf32>
    %15 = vector.shape_cast %14 : vector<256x128xf32> to vector<32x8x128xf32>
    %c0_7 = arith.constant 0 : index
    %c0_8 = arith.constant 0 : index
    %c0_9 = arith.constant 0 : index
    %16 = vector.load %arg4[%c0_7, %c0_8, %c0_9] : memref<32x8x128xf32, #tpu.memory_space<vmem>>, vector<32x8x128xf32>
    tpu.vector_store %arg4[%c0_7, %c0_8, %c0_9], %15 {strides = array<i32>} : memref<32x8x128xf32, #tpu.memory_space<vmem>>, vector<32x8x128xf32>,
    return
  }
  func.func @transform_0(%arg0: i32) -> (i32, i32, i32) {
    %c0_i32 = arith.constant 0 : i32
    %c0_i32_0 = arith.constant 0 : i32
    %c0_i32_1 = arith.constant 0 : i32
    return %arg0, %c0_i32, %c0_i32_0 : i32, i32, i32
  }
  func.func @transform_1(%arg0: i32) -> (i32, i32, i32) {
    %c0_i32 = arith.constant 0 : i32
    %c0_i32_0 = arith.constant 0 : i32
    %c0_i32_1 = arith.constant 0 : i32
    return %arg0, %c0_i32, %c0_i32_0 : i32, i32, i32
  }
  func.func @transform_2(%arg0: i32) -> (i32, i32) {
    %c0_i32 = arith.constant 0 : i32
    %c0_i32_0 = arith.constant 0 : i32
    %c0_i32_1 = arith.constant 0 : i32
    return %c0_i32, %c0_i32_0 : i32, i32
  }
  func.func @transform_3(%arg0: i32) -> (i32, i32, i32) {
    %c0_i32 = arith.constant 0 : i32
    %c0_i32_0 = arith.constant 0 : i32
    %c0_i32_1 = arith.constant 0 : i32
    return %arg0, %c0_i32, %c0_i32_0 : i32, i32, i32
  }
}

</mosaic_0001>

<bundles_post_ra>
// kernel: tpu_custom_call.1
= control target key start
LH: loop header
LB: loop body
LE: loop exit
PB: predicated region body
PF: predicated region fallthrough
CT: control target
= control target key end

     0   :  { %v15_v0 = vlaneseq  ;;  %v1059_v1 = vmov 0   ;;  %s1438_s0 = inlined_call_operand.vmem [shape: s32[32,8,1], index: 0, kind: input, shape index: {}]   ;;  %s1439_s1 = inlined_call_operand.vmem [shape: s32[32,1,1], index: 1, kind: input, shape index: {}]   ;;  %s1440_s2 = inlined_call_operand.vmem [shape: f32[128,128], index: 2, kind: input, shape index: {}]   ;;  %s1441_s3 = inlined_call_operand.hbm [shape: f32[32,8,128], index: 3, kind: output, shape index: {}]  }
   0x1   :  { %1034 = vset.pattern.permute.xlu1 %v1059_v1  ;;  %1033 = vset.pattern.permute.xlu0 %v1059_v1  ;;  %v757_v2 = vld [vmem:[%s1439_s1 + $0x1] ss:$0 sm:$0xff]  ;;  %v756_v3 = vld [vmem:[%s1439_s1] ss:$0 sm:$0xff]  ;;  %v773_v4 = vld [vmem:[%s1439_s1 + $0x11] ss:$0 sm:$0xff] }
   0x2   :  { %v1094_v5 = vshrl.u32 %v15_v0, 7  ;;  %v210_v6 = vld [vmem:[%s1438_s0 + $0x8] sm:$0xff]  ;;  %v209_v7 = vld [vmem:[%s1438_s0] sm:$0xff]  ;;  %v772_v8 = vld [vmem:[%s1439_s1 + $0x10] ss:$0 sm:$0xff] }
   0x3   :  { %v226_v9 = vld [vmem:[%s1438_s0 + $0x88] sm:$0xff]  ;;  %v225_v10 = vld [vmem:[%s1438_s0 + $0x80] sm:$0xff]  ;;  %v774_v13 = vld [vmem:[%s1439_s1 + $0x12] ss:$0 sm:$0xff] }
   0x4   :  { %vm178_vm0 = vcmp.lt.s32.totalorder %v1094_v5, %v757_v2  ;;  %vm177_vm1 = vcmp.lt.s32.totalorder %v1094_v5, %v756_v3  ;;  %vm194_vm2 = vcmp.lt.s32.totalorder %v1094_v5, %v773_v4  ;;  %vm193_vm3 = vcmp.lt.s32.totalorder %v1094_v5, %v772_v8  ;;  %v758_v14 = vld [vmem:[%s1439_s1 + $0x2] ss:$0 sm:$0xff]  ;;  %v227_v17 = vld [vmem:[%s1438_s0 + $0x90] sm:$0xff]  ;;  %v759_v20 = vld [vmem:[%s1439_s1 + $0x3] ss:$0 sm:$0xff] }
   0x5   :  { %v242_v11 = vsel %vm178_vm0, %v210_v6, 4294967295  ;;  %v241_v12 = vsel %vm177_vm1, %v209_v7, 4294967295  ;;  %v258_v15 = vsel %vm194_vm2, %v226_v9, 4294967295  ;;  %v257_v16 = vsel %vm193_vm3, %v225_v10, 4294967295  ;;  %v211_v18 = vld [vmem:[%s1438_s0 + $0x10] sm:$0xff]  ;;  %v228_v23 = vld [vmem:[%s1438_s0 + $0x98] sm:$0xff] }
   0x6   :  { %279 = vperm.xlu1 %1034, %v242_v11   ;;  %276 = vperm.xlu0 %1033, %v241_v12   ;;  %vm195_vm4 = vcmp.lt.s32.totalorder %v1094_v5, %v774_v13  ;;  %vm179_vm5 = vcmp.lt.s32.totalorder %v1094_v5, %v758_v14  ;;  %v775_v19 = vld [vmem:[%s1439_s1 + $0x13] ss:$0 sm:$0xff]  ;;  %vm180_vm7 = vcmp.lt.s32.totalorder %v1094_v5, %v759_v20  ;;  %v212_v24 = vld [vmem:[%s1438_s0 + $0x18] sm:$0xff]  ;;  %v776_v25 = vld [vmem:[%s1439_s1 + $0x14] ss:$0 sm:$0xff] }
   0x7   :  { %v259_v21 = vsel %vm195_vm4, %v227_v17, 4294967295  ;;  %v243_v22 = vsel %vm179_vm5, %v211_v18, 4294967295  ;;  %vm196_vm6 = vcmp.lt.s32.totalorder %v1094_v5, %v775_v19  ;;  %v760_v26 = vld [vmem:[%s1439_s1 + $0x4] ss:$0 sm:$0xff]  ;;  %v244_v28 = vsel %vm180_vm7, %v212_v24, 4294967295  ;;  %v230_v35 = vld [vmem:[%s1438_s0 + $0xa8] sm:$0xff] }
   0x8   :  { %v260_v27 = vsel %vm196_vm6, %v228_v23, 4294967295  ;;  %vm197_vm8 = vcmp.lt.s32.totalorder %v1094_v5, %v776_v25  ;;  %v229_v29 = vld [vmem:[%s1438_s0 + $0xa0] sm:$0xff]  ;;  %vm181_vm9 = vcmp.lt.s32.totalorder %v1094_v5, %v760_v26  ;;  %v777_v31 = vld [vmem:[%s1439_s1 + $0x15] ss:$0 sm:$0xff]  ;;  %v214_v36 = vld [vmem:[%s1438_s0 + $0x28] sm:$0xff] }
   0x9   :  { %v213_v30 = vld [vmem:[%s1438_s0 + $0x20] sm:$0xff]  ;;  %v261_v33 = vsel %vm197_vm8, %v229_v29, 4294967295  ;;  %vm198_vm10 = vcmp.lt.s32.totalorder %v1094_v5, %v777_v31  ;;  %v778_v37 = vld [vmem:[%s1439_s1 + $0x16] ss:$0 sm:$0xff]  ;;  %v468_v40 = vld [vmem:[%s1440_s2 + $0x8] sm:$0xff] }
   0xa   :  { %327 = vperm.xlu1 %1034, %v258_v15   ;;  %324 = vperm.xlu0 %1033, %v257_v16   ;;  %v761_v32 = vld [vmem:[%s1439_s1 + $0x5] ss:$0 sm:$0xff]  ;;  %v245_v34 = vsel %vm181_vm9, %v213_v30, 4294967295  ;;  %v762_v38 = vld [vmem:[%s1439_s1 + $0x6] ss:$0 sm:$0xff]  ;;  %v262_v41 = vsel %vm198_vm10, %v230_v35, 4294967295  ;;  %vm199_vm12 = vcmp.lt.s32.totalorder %v1094_v5, %v778_v37 }
   0xb   :  { %vm182_vm11 = vcmp.lt.s32.totalorder %v1094_v5, %v761_v32  ;;  %v467_v39 = vld [vmem:[%s1440_s2] sm:$0xff]  ;;  %v469_v44 = vld [vmem:[%s1440_s2 + $0x10] sm:$0xff]  ;;  %v470_v45 = vld [vmem:[%s1440_s2 + $0x18] sm:$0xff]  ;;  %vm183_vm13 = vcmp.lt.s32.totalorder %v1094_v5, %v762_v38 }
   0xc   :  { %v246_v42 = vsel %vm182_vm11, %v214_v36, 4294967295  ;;  %v980_v43 = vpack.c.bf16 %v468_v40, %v467_v39  ;;  %v231_v46 = vld [vmem:[%s1438_s0 + $0xb0] sm:$0xff]  ;;  %v984_v49 = vpack.c.bf16 %v470_v45, %v469_v44  ;;  %v763_v50 = vld [vmem:[%s1439_s1 + $0x7] ss:$0 sm:$0xff]  ;;  %v472_v52 = vld [vmem:[%s1440_s2 + $0x28] sm:$0xff] }
   0xd   :  { %v215_v47 = vld [vmem:[%s1438_s0 + $0x30] sm:$0xff]  ;;  %v471_v51 = vld [vmem:[%s1440_s2 + $0x20] sm:$0xff]  ;;  %v263_v53 = vsel %vm199_vm12, %v231_v46, 4294967295 }
   0xe   :  { %330 = vperm.xlu1 %1034, %v259_v21   ;;  %282 = vperm.xlu0 %1033, %v243_v22   ;;  %v779_v48 = vld [vmem:[%s1439_s1 + $0x17] ss:$0 sm:$0xff]  ;;  %v247_v54 = vsel %vm183_vm13, %v215_v47, 4294967295 }
   0xf   :  { %981 = vmatprep.subr.bf16.mxu0 %v980_v43  ;;  %1012 = vmatprep.subr.bf16.mxu1 %v980_v43 }
  0x10   :  { %983 = vmatpush3.bf16.msra.mxu0 %v980_v43  ;;  %1020 = vmatpush3.bf16.msra.mxu1 %v980_v43 }
  0x12   :  { %333 = vperm.xlu1 %1034, %v260_v27   ;;  %285 = vperm.xlu0 %1033, %v244_v28  }
  0x16   :  { %336 = vperm.xlu1 %1034, %v261_v33   ;;  %288 = vperm.xlu0 %1033, %v245_v34  }
  0x1a   :  { %339 = vperm.xlu1 %1034, %v262_v41   ;;  %291 = vperm.xlu0 %1033, %v246_v42  }
  0x1b   :  { %8 = vsyncpa [#allocation3], 0  ;;  %vm200_vm14 = vcmp.lt.s32.totalorder %v1094_v5, %v779_v48  ;;  %v232_v55 = vld [vmem:[%s1438_s0 + $0xb8] sm:$0xff]  ;;  %vm184_vm15 = vcmp.lt.s32.totalorder %v1094_v5, %v763_v50  ;;  %985 = vmatprep.subr.bf16.mxu0 %v984_v49  ;;  %1013 = vmatprep.subr.bf16.mxu1 %v984_v49  ;;  %v988_v58 = vpack.c.bf16 %v472_v52, %v471_v51  ;;  %v764_v59 = vld [vmem:[%s1439_s1 + $0x8] ss:$0 sm:$0xff] }
  0x1c   :  { %v216_v56 = vld [vmem:[%s1438_s0 + $0x38] sm:$0xff]  ;;  %v473_v60 = vld [vmem:[%s1440_s2 + $0x30] sm:$0xff]  ;;  %v264_v62 = vsel %vm200_vm14, %v232_v55, 4294967295  ;;  %987 = vmatpush3.bf16.msra.mxu0 %v984_v49  ;;  %1021 = vmatpush3.bf16.msra.mxu1 %v984_v49  ;;  %v233_v1 = vld [vmem:[%s1438_s0 + $0xc0] sm:$0xff]  ;;  %vm185_vm1 = vcmp.lt.s32.totalorder %v1094_v5, %v764_v59 }
  0x1d   :  { %v780_v57 = vld [vmem:[%s1439_s1 + $0x18] ss:$0 sm:$0xff]  ;;  %v248_v63 = vsel %vm184_vm15, %v216_v56, 4294967295  ;;  %v217_v2 = vld [vmem:[%s1438_s0 + $0x40] sm:$0xff]  ;;  %v781_v3 = vld [vmem:[%s1439_s1 + $0x19] ss:$0 sm:$0xff]  ;;  %989 = vmatprep.subr.bf16.mxu0 %v988_v58  ;;  %1014 = vmatprep.subr.bf16.mxu1 %v988_v58 }
  0x1e   :  { %v474_v61 = vld [vmem:[%s1440_s2 + $0x38] sm:$0xff]  ;;  %342 = vperm.xlu1 %1034, %v263_v53   ;;  %294 = vperm.xlu0 %1033, %v247_v54   ;;  %vm201_vm0 = vcmp.lt.s32.totalorder %v1094_v5, %v780_v57  ;;  %v765_v6 = vld [vmem:[%s1439_s1 + $0x9] ss:$0 sm:$0xff]  ;;  %v475_v7 = vld [vmem:[%s1440_s2 + $0x40] sm:$0xff]  ;;  %v249_v10 = vsel %vm185_vm1, %v217_v2, 4294967295  ;;  %vm202_vm2 = vcmp.lt.s32.totalorder %v1094_v5, %v781_v3 }
  0x1f   :  { %v992_v4 = vpack.c.bf16 %v474_v61, %v473_v60  ;;  %v476_v8 = vld [vmem:[%s1440_s2 + $0x48] sm:$0xff]  ;;  %v265_v9 = vsel %vm201_vm0, %v233_v1, 4294967295  ;;  %vm186_vm3 = vcmp.lt.s32.totalorder %v1094_v5, %v765_v6  ;;  %v782_v13 = vld [vmem:[%s1439_s1 + $0x1a] ss:$0 sm:$0xff]  ;;  %v477_v16 = vld [vmem:[%s1440_s2 + $0x50] sm:$0xff]  ;;  %v1360_v61 = vand.u32 127, %v15_v0 }
  0x20   :  { %991 = vmatpush3.bf16.msra.mxu0 %v988_v58  ;;  %1022 = vmatpush3.bf16.msra.mxu1 %v988_v58  ;;  %v234_v11 = vld [vmem:[%s1438_s0 + $0xc8] sm:$0xff]  ;;  %v996_v14 = vpack.c.bf16 %v476_v8, %v475_v7  ;;  %v478_v17 = vld [vmem:[%s1440_s2 + $0x58] sm:$0xff]  ;;  %vm203_vm4 = vcmp.lt.s32.totalorder %v1094_v5, %v782_v13  ;;  %v235_v20 = vld [vmem:[%s1438_s0 + $0xd0] sm:$0xff] }
  0x21   :  { %v218_v12 = vld [vmem:[%s1438_s0 + $0x48] sm:$0xff]  ;;  %993 = vmatprep.subr.bf16.mxu0 %v992_v4  ;;  %1015 = vmatprep.subr.bf16.mxu1 %v992_v4  ;;  %v266_v18 = vsel %vm202_vm2, %v234_v11, 4294967295  ;;  %v219_v21 = vld [vmem:[%s1438_s0 + $0x50] sm:$0xff]  ;;  %v783_v22 = vld [vmem:[%s1439_s1 + $0x1b] ss:$0 sm:$0xff]  ;;  %v1000_v23 = vpack.c.bf16 %v478_v17, %v477_v16  ;;  %v267_v27 = vsel %vm203_vm4, %v235_v20, 4294967295 }
  0x22   :  { %345 = vperm.xlu1 %1034, %v264_v62   ;;  %297 = vperm.xlu0 %1033, %v248_v63   ;;  %v766_v15 = vld [vmem:[%s1439_s1 + $0xa] ss:$0 sm:$0xff]  ;;  %v250_v19 = vsel %vm186_vm3, %v218_v12, 4294967295  ;;  %v767_v24 = vld [vmem:[%s1439_s1 + $0xb] ss:$0 sm:$0xff]  ;;  %v479_v25 = vld [vmem:[%s1440_s2 + $0x60] sm:$0xff]  ;;  %vm204_vm6 = vcmp.lt.s32.totalorder %v1094_v5, %v783_v22 }
  0x23   :  { %vm187_vm5 = vcmp.lt.s32.totalorder %v1094_v5, %v766_v15  ;;  %v480_v26 = vld [vmem:[%s1440_s2 + $0x68] sm:$0xff]  ;;  %v236_v29 = vld [vmem:[%s1438_s0 + $0xd8] sm:$0xff]  ;;  %vm188_vm7 = vcmp.lt.s32.totalorder %v1094_v5, %v767_v24  ;;  %v481_v34 = vld [vmem:[%s1440_s2 + $0x70] sm:$0xff] }
  0x24   :  { %995 = vmatpush3.bf16.msra.mxu0 %v992_v4  ;;  %1023 = vmatpush3.bf16.msra.mxu1 %v992_v4  ;;  %v251_v28 = vsel %vm187_vm5, %v219_v21, 4294967295  ;;  %v220_v30 = vld [vmem:[%s1438_s0 + $0x58] sm:$0xff]  ;;  %v1004_v32 = vpack.c.bf16 %v480_v26, %v479_v25  ;;  %v768_v33 = vld [vmem:[%s1439_s1 + $0xc] ss:$0 sm:$0xff]  ;;  %v268_v36 = vsel %vm204_vm6, %v236_v29, 4294967295  ;;  %v237_v38 = vld [vmem:[%s1438_s0 + $0xe0] sm:$0xff] }
  0x25   :  { %997 = vmatprep.subr.bf16.mxu0 %v996_v14  ;;  %1016 = vmatprep.subr.bf16.mxu1 %v996_v14  ;;  %v784_v31 = vld [vmem:[%s1439_s1 + $0x1c] ss:$0 sm:$0xff]  ;;  %v252_v37 = vsel %vm188_vm7, %v220_v30, 4294967295  ;;  %vm189_vm9 = vcmp.lt.s32.totalorder %v1094_v5, %v768_v33  ;;  %v221_v39 = vld [vmem:[%s1438_s0 + $0x60] sm:$0xff]  ;;  %v785_v41 = vld [vmem:[%s1439_s1 + $0x1d] ss:$0 sm:$0xff] }
  0x26   :  { %348 = vperm.xlu1 %1034, %v265_v9   ;;  %300 = vperm.xlu0 %1033, %v249_v10   ;;  %v482_v35 = vld [vmem:[%s1440_s2 + $0x78] sm:$0xff]  ;;  %vm205_vm8 = vcmp.lt.s32.totalorder %v1094_v5, %v784_v31  ;;  %v769_v42 = vld [vmem:[%s1439_s1 + $0xd] ss:$0 sm:$0xff]  ;;  %v253_v44 = vsel %vm189_vm9, %v221_v39, 4294967295  ;;  %vm206_vm10 = vcmp.lt.s32.totalorder %v1094_v5, %v785_v41  ;;  %v770_v48 = vld [vmem:[%s1439_s1 + $0xe] ss:$0 sm:$0xff] }
  0x27   :  { %v1008_v40 = vpack.c.bf16 %v482_v35, %v481_v34  ;;  %v269_v43 = vsel %vm205_vm8, %v237_v38, 4294967295  ;;  %v238_v45 = vld [vmem:[%s1438_s0 + $0xe8] sm:$0xff]  ;;  %vm190_vm11 = vcmp.lt.s32.totalorder %v1094_v5, %v769_v42  ;;  %v786_v47 = vld [vmem:[%s1439_s1 + $0x1e] ss:$0 sm:$0xff]  ;;  %v239_v51 = vld [vmem:[%s1438_s0 + $0xf0] sm:$0xff]  ;;  %vm191_vm13 = vcmp.lt.s32.totalorder %v1094_v5, %v770_v48 }
  0x28   :  { %999 = vmatpush3.bf16.msra.mxu0 %v996_v14  ;;  %1024 = vmatpush3.bf16.msra.mxu1 %v996_v14  ;;  %v222_v46 = vld [vmem:[%s1438_s0 + $0x68] sm:$0xff]  ;;  %v270_v49 = vsel %vm206_vm10, %v238_v45, 4294967295  ;;  %vm207_vm12 = vcmp.lt.s32.totalorder %v1094_v5, %v786_v47  ;;  %v223_v52 = vld [vmem:[%s1438_s0 + $0x70] sm:$0xff]  ;;  %v787_v53 = vld [vmem:[%s1439_s1 + $0x1f] ss:$0 sm:$0xff] }
  0x29   :  { %1001 = vmatprep.subr.bf16.mxu0 %v1000_v23  ;;  %1017 = vmatprep.subr.bf16.mxu1 %v1000_v23  ;;  %v254_v50 = vsel %vm190_vm11, %v222_v46, 4294967295  ;;  %v771_v54 = vld [vmem:[%s1439_s1 + $0xf] ss:$0 sm:$0xff]  ;;  %v271_v55 = vsel %vm207_vm12, %v239_v51, 4294967295  ;;  %v255_v56 = vsel %vm191_vm13, %v223_v52, 4294967295  ;;  %vm208_vm14 = vcmp.lt.s32.totalorder %v1094_v5, %v787_v53  ;;  %v240_v57 = vld [vmem:[%s1438_s0 + $0xf8] sm:$0xff] }
  0x2a   :  { %351 = vperm.xlu1 %1034, %v266_v18   ;;  %303 = vperm.xlu0 %1033, %v250_v19   ;;  %vm192_vm15 = vcmp.lt.s32.totalorder %v1094_v5, %v771_v54  ;;  %v224_v58 = vld [vmem:[%s1438_s0 + $0x78] sm:$0xff]  ;;  %v272_v59 = vsel %vm208_vm14, %v240_v57, 4294967295  ;;  %v1060_v5 = vmov 1.0   ;;  %s1061_s0 = smov [#allocation2]  }
  0x2b   :  { %v256_v60 = vsel %vm192_vm15, %v224_v58, 4294967295  ;;  %s745_s1 = sshll.u32 %s1061_s0, 4  ;;  %s746_s1 = int_to_ptr.vmem [resolvable:$true] %s745_s1 }
  0x2c   :  { %1003 = vmatpush3.bf16.msra.mxu0 %v1000_v23  ;;  %1025 = vmatpush3.bf16.msra.mxu1 %v1000_v23  ;;  %s1035_s9 = scalar_lea.vmem %s746_s1, 4096  ;;  %p1040_p1 = scmp.lt.s32.totalorder %s746_s1, %s746_s1 }
  0x2d   :  { %1005 = vmatprep.subr.bf16.mxu0 %v1004_v32  ;;  %1018 = vmatprep.subr.bf16.mxu1 %v1004_v32  ;;  %p1036_p0 = scmp.ne.s32.totalorder %s746_s1, %s1035_s9  ;;  %p1041_p2 = scmp.lt.s32.totalorder %s1035_s9, %s1035_s9 }
  0x2e   :  { %354 = vperm.xlu1 %1034, %v267_v27   ;;  %306 = vperm.xlu0 %1033, %v251_v28  }
  0x2f   :  { %p1042_p3 = por %p1041_p2, %p1040_p1 }
  0x30   :  { %1007 = vmatpush3.bf16.msra.mxu0 %v1004_v32  ;;  %1026 = vmatpush3.bf16.msra.mxu1 %v1004_v32 }
  0x31   :  { %1009 = vmatprep.subr.bf16.mxu0 %v1008_v40  ;;  %1019 = vmatprep.subr.bf16.mxu1 %v1008_v40  ;;  %p1043_p4 = pnand %p1042_p3, %p1036_p0 }
  0x32   :  { %357 = vperm.xlu1 %1034, %v268_v36   ;;  %309 = vperm.xlu0 %1033, %v252_v37  }
  0x34   :  { %1011 = vmatpush3.bf16.msra.mxu0 %v1008_v40  ;;  %1027 = vmatpush3.bf16.msra.mxu1 %v1008_v40 }
  0x36   :  { %360 = vperm.xlu1 %1034, %v269_v43   ;;  %312 = vperm.xlu0 %1033, %v253_v44  }
  0x3a   :  { %363 = vperm.xlu1 %1034, %v270_v49   ;;  %315 = vperm.xlu0 %1033, %v254_v50  }
  0x3e   :  { %366 = vperm.xlu1 %1034, %v271_v55   ;;  %318 = vperm.xlu0 %1033, %v255_v56  }
  0x42   :  { %369 = vperm.xlu1 %1034, %v272_v59   ;;  %321 = vperm.xlu0 %1033, %v256_v60  }
  0x85   :  { %v280_v62 = vpop.permute.xlu1 %279  ;;  %v277_v63 = vpop.permute.xlu0 %276 }
  0x86   :  { %vm372_vm0 = vcmp.eq.s32.totalorder %v1360_v61, %v280_v62  ;;  %vm371_vm1 = vcmp.eq.s32.totalorder %v1360_v61, %v277_v63 }
  0x87   :  { %932 = vmatprep.mubr.msk.f32.mxu0 %vm371_vm1, %v1060_v5 }
  0x88   :  { %933 = vmatmul.mubr.msk.f32.vlgmr.msra.gmra.mrb[0].mxu0 %vm372_vm0, %v1060_v5 }
  0x89   :  { %v328_v1 = vpop.permute.xlu1 %327  ;;  %v325_v2 = vpop.permute.xlu0 %324 }
  0x8a   :  { %vm388_vm2 = vcmp.eq.s32.totalorder %v1360_v61, %v328_v1  ;;  %vm387_vm3 = vcmp.eq.s32.totalorder %v1360_v61, %v325_v2 }
  0x8b   :  { %956 = vmatprep.mubr.msk.f32.mxu1 %vm387_vm3, %v1060_v5 }
  0x8c   :  { %957 = vmatmul.mubr.msk.f32.vlgmr.msra.gmra.mrb[0].mxu1 %vm388_vm2, %v1060_v5 }
  0x8d   :  { %v331_v0 = vpop.permute.xlu1 %330  ;;  %v283_v3 = vpop.permute.xlu0 %282 }
  0x8e   :  { %vm389_vm4 = vcmp.eq.s32.totalorder %v1360_v61, %v331_v0  ;;  %vm373_vm5 = vcmp.eq.s32.totalorder %v1360_v61, %v283_v3 }
  0x8f   :  { %935 = vmatprep.mubr.msk.f32.mxu0 %vm373_vm5, %v1060_v5  ;;  %959 = vmatprep.mubr.msk.f32.mxu1 %vm389_vm4, %v1060_v5 }
  0x91   :  { %v334_v4 = vpop.permute.xlu1 %333  ;;  %v286_v6 = vpop.permute.xlu0 %285 }
  0x92   :  { %vm390_vm6 = vcmp.eq.s32.totalorder %v1360_v61, %v334_v4  ;;  %vm374_vm7 = vcmp.eq.s32.totalorder %v1360_v61, %v286_v6 }
  0x93   :  { %936 = vmatmul.mubr.msk.f32.gmra.mrb[2].mxu0 %vm374_vm7, %v1060_v5  ;;  %960 = vmatmul.mubr.msk.f32.gmra.mrb[2].mxu1 %vm390_vm6, %v1060_v5 }
  0x95   :  { %v337_v7 = vpop.permute.xlu1 %336  ;;  %v289_v8 = vpop.permute.xlu0 %288 }
  0x96   :  { %vm391_vm8 = vcmp.eq.s32.totalorder %v1360_v61, %v337_v7  ;;  %vm375_vm9 = vcmp.eq.s32.totalorder %v1360_v61, %v289_v8 }
  0x97   :  { %938 = vmatprep.mubr.msk.f32.mxu0 %vm375_vm9, %v1060_v5  ;;  %962 = vmatprep.mubr.msk.f32.mxu1 %vm391_vm8, %v1060_v5 }
  0x99   :  { %v340_v9 = vpop.permute.xlu1 %339  ;;  %v292_v10 = vpop.permute.xlu0 %291 }
  0x9a   :  { %vm392_vm10 = vcmp.eq.s32.totalorder %v1360_v61, %v340_v9  ;;  %vm376_vm11 = vcmp.eq.s32.totalorder %v1360_v61, %v292_v10 }
  0x9b   :  { %939 = vmatmul.mubr.msk.f32.gmra.mrb[4].mxu0 %vm376_vm11, %v1060_v5  ;;  %963 = vmatmul.mubr.msk.f32.gmra.mrb[4].mxu1 %vm392_vm10, %v1060_v5 }
  0x9d   :  { %v343_v11 = vpop.permute.xlu1 %342  ;;  %v295_v12 = vpop.permute.xlu0 %294 }
  0x9e   :  { %vm393_vm12 = vcmp.eq.s32.totalorder %v1360_v61, %v343_v11  ;;  %vm377_vm13 = vcmp.eq.s32.totalorder %v1360_v61, %v295_v12 }
  0x9f   :  { %941 = vmatprep.mubr.msk.f32.mxu0 %vm377_vm13, %v1060_v5  ;;  %965 = vmatprep.mubr.msk.f32.mxu1 %vm393_vm12, %v1060_v5 }
  0xa1   :  { %v346_v13 = vpop.permute.xlu1 %345  ;;  %v298_v14 = vpop.permute.xlu0 %297 }
  0xa2   :  { %vm394_vm14 = vcmp.eq.s32.totalorder %v1360_v61, %v346_v13  ;;  %vm378_vm15 = vcmp.eq.s32.totalorder %v1360_v61, %v298_v14 }
  0xa3   :  { %942 = vmatmul.mubr.msk.f32.gmra.mrb[6].mxu0 %vm378_vm15, %v1060_v5  ;;  %966 = vmatmul.mubr.msk.f32.gmra.mrb[6].mxu1 %vm394_vm14, %v1060_v5 }
  0xa5   :  { %v349_v15 = vpop.permute.xlu1 %348  ;;  %v301_v16 = vpop.permute.xlu0 %300 }
  0xa6   :  { %vm395_vm0 = vcmp.eq.s32.totalorder %v1360_v61, %v349_v15  ;;  %vm379_vm1 = vcmp.eq.s32.totalorder %v1360_v61, %v301_v16 }
  0xa7   :  { %944 = vmatprep.mubr.msk.f32.mxu0 %vm379_vm1, %v1060_v5  ;;  %968 = vmatprep.mubr.msk.f32.mxu1 %vm395_vm0, %v1060_v5 }
  0xa9   :  { %v352_v17 = vpop.permute.xlu1 %351  ;;  %v304_v18 = vpop.permute.xlu0 %303 }
  0xaa   :  { %vm396_vm2 = vcmp.eq.s32.totalorder %v1360_v61, %v352_v17  ;;  %vm380_vm3 = vcmp.eq.s32.totalorder %v1360_v61, %v304_v18 }
  0xab   :  { %945 = vmatmul.mubr.msk.f32.gmra.mrb[8].mxu0 %vm380_vm3, %v1060_v5  ;;  %969 = vmatmul.mubr.msk.f32.gmra.mrb[8].mxu1 %vm396_vm2, %v1060_v5 }
  0xad   :  { %v355_v19 = vpop.permute.xlu1 %354  ;;  %v307_v20 = vpop.permute.xlu0 %306 }
  0xae   :  { %vm397_vm4 = vcmp.eq.s32.totalorder %v1360_v61, %v355_v19  ;;  %vm381_vm5 = vcmp.eq.s32.totalorder %v1360_v61, %v307_v20 }
  0xaf   :  { %947 = vmatprep.mubr.msk.f32.mxu0 %vm381_vm5, %v1060_v5  ;;  %971 = vmatprep.mubr.msk.f32.mxu1 %vm397_vm4, %v1060_v5 }
  0xb1   :  { %v358_v21 = vpop.permute.xlu1 %357  ;;  %v310_v22 = vpop.permute.xlu0 %309 }
  0xb2   :  { %vm398_vm6 = vcmp.eq.s32.totalorder %v1360_v61, %v358_v21  ;;  %vm382_vm7 = vcmp.eq.s32.totalorder %v1360_v61, %v310_v22 }
  0xb3   :  { %948 = vmatmul.mubr.msk.f32.gmra.mrb[10].mxu0 %vm382_vm7, %v1060_v5  ;;  %972 = vmatmul.mubr.msk.f32.gmra.mrb[10].mxu1 %vm398_vm6, %v1060_v5 }
  0xb5   :  { %v361_v23 = vpop.permute.xlu1 %360  ;;  %v313_v24 = vpop.permute.xlu0 %312 }
  0xb6   :  { %vm399_vm8 = vcmp.eq.s32.totalorder %v1360_v61, %v361_v23  ;;  %vm383_vm9 = vcmp.eq.s32.totalorder %v1360_v61, %v313_v24 }
  0xb7   :  { %950 = vmatprep.mubr.msk.f32.mxu0 %vm383_vm9, %v1060_v5  ;;  %974 = vmatprep.mubr.msk.f32.mxu1 %vm399_vm8, %v1060_v5 }
  0xb9   :  { %v364_v25 = vpop.permute.xlu1 %363  ;;  %v316_v26 = vpop.permute.xlu0 %315 }
  0xba   :  { %vm400_vm10 = vcmp.eq.s32.totalorder %v1360_v61, %v364_v25  ;;  %vm384_vm11 = vcmp.eq.s32.totalorder %v1360_v61, %v316_v26 }
  0xbb   :  { %951 = vmatmul.mubr.msk.f32.gmra.mrb[12].mxu0 %vm384_vm11, %v1060_v5  ;;  %975 = vmatmul.mubr.msk.f32.gmra.mrb[12].mxu1 %vm400_vm10, %v1060_v5 }
  0xbd   :  { %v367_v27 = vpop.permute.xlu1 %366  ;;  %v319_v28 = vpop.permute.xlu0 %318 }
  0xbe   :  { %vm401_vm12 = vcmp.eq.s32.totalorder %v1360_v61, %v367_v27  ;;  %vm385_vm13 = vcmp.eq.s32.totalorder %v1360_v61, %v319_v28 }
  0xbf   :  { %953 = vmatprep.mubr.msk.f32.mxu0 %vm385_vm13, %v1060_v5  ;;  %977 = vmatprep.mubr.msk.f32.mxu1 %vm401_vm12, %v1060_v5 }
  0xc1   :  { %v370_v29 = vpop.permute.xlu1 %369  ;;  %v322_v30 = vpop.permute.xlu0 %321 }
  0xc2   :  { %vm402_vm14 = vcmp.eq.s32.totalorder %v1360_v61, %v370_v29  ;;  %vm386_vm15 = vcmp.eq.s32.totalorder %v1360_v61, %v322_v30 }
  0xc3   :  { %954 = vmatmul.mubr.msk.f32.gmra.mrb[14].mxu0 %vm386_vm15, %v1060_v5  ;;  %978 = vmatmul.mubr.msk.f32.gmra.mrb[14].mxu1 %vm402_vm14, %v1060_v5 }
 0x15b   :  { %v934_v31 = vpop.f32.mrb[0].mxu0 }
 0x15c   :  { %709 = vst [vmem:[#allocation2 + $0x8] sm:$0xff] %v934_v31  ;;  %v549_v32 = vpop.f32.mrb[1].mxu0 }
 0x15d   :  { %708 = vst [vmem:[#allocation2] sm:$0xff] %v549_v32 }
 0x15f   :  { %v958_v33 = vpop.f32.mrb[0].mxu1 }
 0x160   :  { %725 = vst [vmem:[#allocation2 + $0x88] sm:$0xff] %v958_v33  ;;  %v629_v34 = vpop.f32.mrb[1].mxu1 }
 0x161   :  { %724 = vst [vmem:[#allocation2 + $0x80] sm:$0xff] %v629_v34 }
 0x166   :  { %v937_v35 = vpop.f32.mrb[2].mxu0  ;;  %v961_v36 = vpop.f32.mrb[2].mxu1 }
 0x167   :  { %711 = vst [vmem:[#allocation2 + $0x18] sm:$0xff] %v937_v35  ;;  %727 = vst [vmem:[#allocation2 + $0x98] sm:$0xff] %v961_v36  ;;  %v559_v37 = vpop.f32.mrb[3].mxu0  ;;  %v639_v38 = vpop.f32.mrb[3].mxu1 }
 0x168   :  { %710 = vst [vmem:[#allocation2 + $0x10] sm:$0xff] %v559_v37  ;;  %726 = vst [vmem:[#allocation2 + $0x90] sm:$0xff] %v639_v38 }
 0x16e   :  { %v940_v39 = vpop.f32.mrb[4].mxu0  ;;  %v964_v40 = vpop.f32.mrb[4].mxu1 }
 0x16f   :  { %713 = vst [vmem:[#allocation2 + $0x28] sm:$0xff] %v940_v39  ;;  %729 = vst [vmem:[#allocation2 + $0xa8] sm:$0xff] %v964_v40  ;;  %v569_v41 = vpop.f32.mrb[5].mxu0  ;;  %v649_v42 = vpop.f32.mrb[5].mxu1 }
 0x170   :  { %712 = vst [vmem:[#allocation2 + $0x20] sm:$0xff] %v569_v41  ;;  %728 = vst [vmem:[#allocation2 + $0xa0] sm:$0xff] %v649_v42 }
 0x176   :  { %v943_v43 = vpop.f32.mrb[6].mxu0  ;;  %v967_v44 = vpop.f32.mrb[6].mxu1 }
 0x177   :  { %715 = vst [vmem:[#allocation2 + $0x38] sm:$0xff] %v943_v43  ;;  %731 = vst [vmem:[#allocation2 + $0xb8] sm:$0xff] %v967_v44  ;;  %v579_v45 = vpop.f32.mrb[7].mxu0  ;;  %v659_v46 = vpop.f32.mrb[7].mxu1 }
 0x178   :  { %714 = vst [vmem:[#allocation2 + $0x30] sm:$0xff] %v579_v45  ;;  %730 = vst [vmem:[#allocation2 + $0xb0] sm:$0xff] %v659_v46 }
 0x17e   :  { %v946_v47 = vpop.f32.mrb[8].mxu0  ;;  %v970_v48 = vpop.f32.mrb[8].mxu1 }
 0x17f   :  { %717 = vst [vmem:[#allocation2 + $0x48] sm:$0xff] %v946_v47  ;;  %733 = vst [vmem:[#allocation2 + $0xc8] sm:$0xff] %v970_v48  ;;  %v589_v49 = vpop.f32.mrb[9].mxu0  ;;  %v669_v50 = vpop.f32.mrb[9].mxu1 }
 0x180   :  { %716 = vst [vmem:[#allocation2 + $0x40] sm:$0xff] %v589_v49  ;;  %732 = vst [vmem:[#allocation2 + $0xc0] sm:$0xff] %v669_v50 }
 0x186   :  { %v949_v51 = vpop.f32.mrb[10].mxu0  ;;  %v973_v52 = vpop.f32.mrb[10].mxu1 }
 0x187   :  { %719 = vst [vmem:[#allocation2 + $0x58] sm:$0xff] %v949_v51  ;;  %735 = vst [vmem:[#allocation2 + $0xd8] sm:$0xff] %v973_v52  ;;  %v599_v53 = vpop.f32.mrb[11].mxu0  ;;  %v679_v54 = vpop.f32.mrb[11].mxu1 }
 0x188   :  { %718 = vst [vmem:[#allocation2 + $0x50] sm:$0xff] %v599_v53  ;;  %734 = vst [vmem:[#allocation2 + $0xd0] sm:$0xff] %v679_v54 }
 0x18e   :  { %v952_v55 = vpop.f32.mrb[12].mxu0  ;;  %v976_v56 = vpop.f32.mrb[12].mxu1 }
 0x18f   :  { %721 = vst [vmem:[#allocation2 + $0x68] sm:$0xff] %v952_v55  ;;  %737 = vst [vmem:[#allocation2 + $0xe8] sm:$0xff] %v976_v56  ;;  %v609_v57 = vpop.f32.mrb[13].mxu0  ;;  %v689_v58 = vpop.f32.mrb[13].mxu1 }
 0x190   :  { %720 = vst [vmem:[#allocation2 + $0x60] sm:$0xff] %v609_v57  ;;  %736 = vst [vmem:[#allocation2 + $0xe0] sm:$0xff] %v689_v58 }
 0x196   :  { %v955_v59 = vpop.f32.mrb[14].mxu0  ;;  %v979_v60 = vpop.f32.mrb[14].mxu1 }
 0x197   :  { %723 = vst [vmem:[#allocation2 + $0x78] sm:$0xff] %v955_v59  ;;  %739 = vst [vmem:[#allocation2 + $0xf8] sm:$0xff] %v979_v60  ;;  %v619_v61 = vpop.f32.mrb[15].mxu0  ;;  %v699_v62 = vpop.f32.mrb[15].mxu1 }
 0x198   :  { %722 = vst [vmem:[#allocation2 + $0x70] sm:$0xff] %v619_v61  ;;  %738 = vst [vmem:[#allocation2 + $0xf0] sm:$0xff] %v699_v62 }
 0x199   :  { %1046 = shalt.err (!%p1043_p4)
}
 0x19a   :  { %s1047_s12 = scalar_lea.hbm %s1441_s3, 4096 }
 0x19b   :  { %p1048_p5 = scmp.ne.s32.totalorder %s1441_s3, %s1047_s12  ;;  %p1051_p6 = scmp.lt.u32.totalorder %s1047_s12, %s1441_s3 }
 0x19d   :  { %p1053_p7 = pnand %p1051_p6, %p1048_p5 }
 0x19f   :  { %1056 = shalt.err (!%p1053_p7)
}
 0x1a0   :  { %s1062_s16 = smov 128   ;;  %s1063_s17 = smov 8  }
 0x1a1   :  { %751 = dma.vmem_to_hbm [thread:$0]  %s746_s1, 4096, %s1441_s3, [#allocation3], %s1062_s16, %s1062_s16, %s1063_s17  }
 0x1a2   :  { %1057 = dma.done.wait [#allocation3], 4096  }
 0x1a3   :  { %1058 = vsyncadd [#allocation3], 4294963200 }
 0x1a4   :  { %755 = vsyncpa [#allocation3], 1 }

</bundles_post_ra>
